<compile_context>
chip_gen: v6e
topology: v6e:2x2x1
jax: 0.10.0
libtpu: 0.0.40
codegen_flags: <defaults>
</compile_context>

<pallas_src>
import math

import jax
import jax.numpy as jnp
from jax.experimental import pallas as pl
from jax.experimental.pallas import tpu as pltpu


# ---------------------------------------------------------------------------
# Kernel 1: support = inp @ weight   (row-tiled over nodes, weight full block)
# ---------------------------------------------------------------------------
def _support_kernel(x_ref, w_ref, s_ref):
    s_ref[...] = jnp.dot(
        x_ref[...], w_ref[...], preferred_element_type=jnp.float32
    ).astype(s_ref.dtype)


# ---------------------------------------------------------------------------
# Kernel 2: out = relu(adj @ support)
#   grid = (row tiles, f_out tiles, K tiles); f32 VMEM accumulator,
#   init at k==0, ReLU + store at k==last. The output block index is constant
#   along k, so the output tile stays resident across the reduction axis.
# ---------------------------------------------------------------------------
def _adj_matmul_relu_kernel(a_ref, s_ref, o_ref, acc_ref):
    k = pl.program_id(2)

    @pl.when(k == 0)
    def _():
        acc_ref[...] = jnp.zeros_like(acc_ref)

    acc_ref[...] += jnp.dot(
        a_ref[...], s_ref[...], preferred_element_type=jnp.float32
    )

    @pl.when(k == pl.num_programs(2) - 1)
    def _():
        o_ref[...] = jnp.maximum(acc_ref[...], 0.0).astype(o_ref.dtype)


def _round_up(x, m):
    return ((x + m - 1) // m) * m


def _pick_tile(n, candidates):
    for c in candidates:
        if n % c == 0:
            return c
    return 128  # n is a multiple of 128, so 128 always divides


def graph_convolution(
    inp,
    adj,
    weight,
    *,
    dropout=0.0,
    training=False,
    tile_n=None,
    tile_k=None,
    tile_f=None,
    use_bf16=True,
):
    """Pallas implementation of GraphConvolution.forward (act = relu, no bias)."""
    # TODO(synk): training-mode dropout (p > 0) would need pltpu.prng_* inside
    # the kernel; with the module default dropout=0.0 / eval mode it is identity.
    del dropout, training

    n, f_in = inp.shape
    assert adj.shape == (n, n)
    assert weight.shape[0] == f_in
    f_out = weight.shape[1]
    out_dtype = inp.dtype

    # bf16 streaming of adj/support (f32 accumulate). Set use_bf16=False for a
    # pure-f32 path (note: default TPU matmul precision is still reduced unless
    # precision=HIGHEST is requested).
    compute_dtype = jnp.bfloat16 if use_bf16 else jnp.float32
    csize = jnp.dtype(compute_dtype).itemsize
    osize = jnp.dtype(out_dtype).itemsize

    # --- pad to lane/tile-friendly shapes ----------------------------------
    n_pad = _round_up(n, 128)
    f_pad = _round_up(f_out, 128)  # lane-dense output / full MXU columns

    # Prefer large row tiles: support re-reads scale as 1/tile_n relative to
    # the N^2 adjacency stream.
    if tile_n is None:
        tile_n = _pick_tile(n_pad, (512, 256, 128))
    if tile_k is None:
        tile_k = _pick_tile(n_pad, (1024, 512, 256, 128))
    if tile_f is None:
        tile_f = _pick_tile(f_pad, (512, 256, 128))
    assert n_pad % tile_n == 0 and n_pad % tile_k == 0 and f_pad % tile_f == 0

    # --- VMEM working-set estimate for kernel 2; shrink tiles if needed -----
    def _est(tn, tk, tf):
        return (
            2 * tn * tk * csize      # adj tile, double-buffered
            + 2 * tk * tf * csize    # support tile, double-buffered
            + tn * tf * 4            # f32 accumulator scratch
            + 2 * tn * tf * osize    # output tile, double-buffered
        )

    budget = 24 << 20  # working-set target; leaves headroom within the limit
    while _est(tile_n, tile_k, tile_f) > budget and tile_k > 128:
        tile_k //= 2  # halving preserves divisibility (n_pad % 128 == 0)
    while _est(tile_n, tile_k, tile_f) > budget and tile_n > 128:
        tile_n //= 2
    while _est(tile_n, tile_k, tile_f) > budget and tile_f > 128:
        tile_f //= 2

    est_k1 = (
        2 * tile_n * f_in * 4        # inp row tile, double-buffered (f32)
        + f_in * f_pad * 4           # full weight block
        + 2 * tile_n * f_pad * csize  # support out tile, double-buffered
    )
    est = max(_est(tile_n, tile_k, tile_f), est_k1)
    # Explicit limit with headroom; capped so it fits v7x's 64 MiB physical VMEM.
    vmem_limit = int(min(max(2 * est + (8 << 20), 16 << 20), 48 << 20))

    # --- pad inputs (pad + dtype cast of adj fuses into one XLA op) ---------
    inp_p = jnp.pad(inp, ((0, n_pad - n), (0, 0)))
    w_p = jnp.pad(weight, ((0, 0), (0, f_pad - f_out)))
    adj_p = jnp.pad(adj, ((0, n_pad - n), (0, n_pad - n))).astype(compute_dtype)

    # --- kernel 1: support = inp @ weight ------------------------------------
    support = pl.pallas_call(
        _support_kernel,
        out_shape=jax.ShapeDtypeStruct((n_pad, f_pad), compute_dtype),
        grid_spec=pltpu.PrefetchScalarGridSpec(
            num_scalar_prefetch=0,
            grid=(n_pad // tile_n,),
            in_specs=[
                pl.BlockSpec((tile_n, f_in), lambda i: (i, 0)),   # inp row tile
                pl.BlockSpec((f_in, f_pad), lambda i: (0, 0)),    # full weight
            ],
            out_specs=pl.BlockSpec((tile_n, f_pad), lambda i: (i, 0)),
        ),
        compiler_params=pltpu.CompilerParams(
            dimension_semantics=("parallel",),
            vmem_limit_bytes=vmem_limit,
        ),
    )(inp_p, w_p)

    # --- kernel 2: out = relu(adj @ support) ----------------------------------
    out_p = pl.pallas_call(
        _adj_matmul_relu_kernel,
        out_shape=jax.ShapeDtypeStruct((n_pad, f_pad), out_dtype),
        grid_spec=pltpu.PrefetchScalarGridSpec(
            num_scalar_prefetch=0,
            grid=(n_pad // tile_n, f_pad // tile_f, n_pad // tile_k),
            in_specs=[
                pl.BlockSpec((tile_n, tile_k), lambda i, j, k: (i, k)),  # adj
                pl.BlockSpec((tile_k, tile_f), lambda i, j, k: (k, j)),  # support
            ],
            out_specs=pl.BlockSpec((tile_n, tile_f), lambda i, j, k: (i, j)),
            scratch_shapes=[pltpu.VMEM((tile_n, tile_f), jnp.float32)],
        ),
        compiler_params=pltpu.CompilerParams(
            dimension_semantics=("parallel", "parallel", "arbitrary"),
            vmem_limit_bytes=vmem_limit,
        ),
    )(adj_p, support)

    return out_p[:n, :f_out]


def xavier_uniform(key, shape, dtype=jnp.float32):
    fan_in, fan_out = shape
    bound = math.sqrt(6.0 / (fan_in + fan_out))
    return jax.random.uniform(key, shape, dtype, minval=-bound, maxval=bound)


if __name__ == "__main__":
    key = jax.random.PRNGKey(0)
    k_x, k_a, k_w = jax.random.split(key, 3)

    # Small GCN-layer shapes; N/F deliberately NOT multiples of 128 to
    # exercise the padding path.
    N, F_IN, F_OUT = 200, 48, 24

    inp = jax.random.normal(k_x, (N, F_IN), dtype=jnp.float32)

    # Symmetric row-normalized adjacency (dense stand-in for spmm input).
    a_raw = (jax.random.uniform(k_a, (N, N)) < 0.1).astype(jnp.float32)
    adj = a_raw + a_raw.T + jnp.eye(N, dtype=jnp.float32)
    adj = adj / jnp.sum(adj, axis=1, keepdims=True)

    weight = xavier_uniform(k_w, (F_IN, F_OUT))

    out = graph_convolution(inp, adj, weight)
    out = jax.block_until_ready(out)

    # Reference check in plain JAX (same math, f32).
    ref = jnp.maximum(adj @ (inp @ weight), 0.0)
    assert out.shape == (N, F_OUT)
    # bf16 adjacency/support stream -> relaxed tolerance vs the f32 reference.
    assert jnp.allclose(out, ref, atol=2e-2, rtol=2e-2)

    print("KERNEL_OK")
</pallas_src>

<mosaic_0001>
module attributes {stable_mosaic.version = 11 : i64} {
  func.func @_support_kernel(%arg0: i32, %arg1: memref<256x48xf32, #tpu.memory_space<vmem>>, %arg2: memref<48x128xf32, #tpu.memory_space<vmem>>, %arg3: memref<256x128xbf16, #tpu.memory_space<vmem>>) attributes {dimension_semantics = [#tpu.dimension_semantics<parallel>], iteration_bounds = array<i64: 1>, scalar_prefetch = 0 : i64, scratch_operands = 0 : i64, tpu.core_type = #tpu.core_type<tc>, window_params = [{transform_indices = @transform_0, window_bounds = array<i64: 256, 48>}, {pipeline_mode = #tpu.pipeline_mode<synchronous>, transform_indices = @transform_1, window_bounds = array<i64: 48, 128>}, {transform_indices = @transform_2, window_bounds = array<i64: 256, 128>}]} {
    %c0 = arith.constant 0 : index
    %c0_0 = arith.constant 0 : index
    %0 = vector.load %arg1[%c0, %c0_0] : memref<256x48xf32, #tpu.memory_space<vmem>>, vector<256x48xf32>
    %c0_1 = arith.constant 0 : index
    %c0_2 = arith.constant 0 : index
    %1 = vector.load %arg2[%c0_1, %c0_2] : memref<48x128xf32, #tpu.memory_space<vmem>>, vector<48x128xf32>
    %cst = arith.constant dense<0.000000e+00> : vector<256x128xf32>
    %2 = tpu.matmul %0, %1, %cst {dimension_numbers = #tpu.dot_dimension_numbers<[1], [0], [0], [1], [0, 0, 1, 1], [], []>} : vector<256x48xf32>, vector<48x128xf32>, vector<256x128xf32> -> vector<256x128xf32>
    %3 = arith.truncf %2 : vector<256x128xf32> to vector<256x128xbf16>
    %c0_3 = arith.constant 0 : index
    %c0_4 = arith.constant 0 : index
    %4 = vector.load %arg3[%c0_3, %c0_4] : memref<256x128xbf16, #tpu.memory_space<vmem>>, vector<256x128xbf16>
    tpu.vector_store %arg3[%c0_3, %c0_4], %3 {strides = array<i32>} : memref<256x128xbf16, #tpu.memory_space<vmem>>, vector<256x128xbf16>,
    return
  }
  func.func @transform_0(%arg0: i32) -> (i32, i32) {
    %c0_i32 = arith.constant 0 : i32
    %c0_i32_0 = arith.constant 0 : i32
    return %arg0, %c0_i32 : i32, i32
  }
  func.func @transform_1(%arg0: i32) -> (i32, i32) {
    %c0_i32 = arith.constant 0 : i32
    %c0_i32_0 = arith.constant 0 : i32
    %c0_i32_1 = arith.constant 0 : i32
    return %c0_i32, %c0_i32_0 : i32, i32
  }
  func.func @transform_2(%arg0: i32) -> (i32, i32) {
    %c0_i32 = arith.constant 0 : i32
    %c0_i32_0 = arith.constant 0 : i32
    return %arg0, %c0_i32 : i32, i32
  }
}

</mosaic_0001>

<bundles_post_ra>
// kernel: tpu_custom_call.1
= control target key start
LH: loop header
LB: loop body
LE: loop exit
PB: predicated region body
PF: predicated region fallthrough
CT: control target
= control target key end

     0   :  { %vm50_vm0 = vcmask 392192   ;;  %s1041_s0 = inlined_call_operand.vmem [shape: f32[256,48], index: 0, kind: input, shape index: {}]   ;;  %s1042_s1 = inlined_call_operand.vmem [shape: f32[48,128], index: 1, kind: input, shape index: {}]   ;;  %s1043_s2 = inlined_call_operand.hbm [shape: bf16[256,128], index: 2, kind: output, shape index: {}]  }
   0x1   :  { %v49_v0 = vld [vmem:[%s1042_s1 + $0x28] sm:$0xff]  ;;  %v48_v1 = vld [vmem:[%s1042_s1 + $0x20] sm:$0xff]  ;;  %v47_v2 = vld [vmem:[%s1042_s1 + $0x18] sm:$0xff] }
   0x2   :  { %777 = vmatprep.subr.mxu0 %v49_v0  ;;  %837 = vmatprep.subr.mxu1 %v49_v0  ;;  %v46_v3 = vld [vmem:[%s1042_s1 + $0x10] sm:$0xff]  ;;  %v45_v4 = vld [vmem:[%s1042_s1 + $0x8] sm:$0xff]  ;;  %v44_v5 = vld [vmem:[%s1042_s1] sm:$0xff] }
   0x3   :  { %778 = vmatpush3.msra.mxu0 %v49_v0  ;;  %843 = vmatpush3.msra.mxu1 %v49_v0  ;;  %v12_v6 = vld [vmem:[%s1041_s0] sm:$0xff]  ;;  %v13_v8 = vld [vmem:[%s1041_s0 + $0x8] sm:$0xff]  ;;  %v14_v10 = vld [vmem:[%s1041_s0 + $0x10] sm:$0xff] }
   0x4   :  { %779 = vmatprep.subr.mxu0 %v48_v1  ;;  %838 = vmatprep.subr.mxu1 %v48_v1  ;;  %v28_v7 = vld [vmem:[%s1041_s0 + $0x80] sm:$0xff]  ;;  %v29_v9 = vld [vmem:[%s1041_s0 + $0x88] sm:$0xff]  ;;  %v30_v11 = vld [vmem:[%s1041_s0 + $0x90] sm:$0xff] }
   0x5   :  { %780 = vmatpush3.msra.mxu0 %v48_v1  ;;  %844 = vmatpush3.msra.mxu1 %v48_v1 }
   0x6   :  { %781 = vmatprep.subr.mxu0 %v47_v2  ;;  %839 = vmatprep.subr.mxu1 %v47_v2 }
   0x7   :  { %782 = vmatpush3.msra.mxu0 %v47_v2  ;;  %845 = vmatpush3.msra.mxu1 %v47_v2 }
   0x8   :  { %783 = vmatprep.subr.mxu0 %v46_v3  ;;  %840 = vmatprep.subr.mxu1 %v46_v3 }
   0x9   :  { %784 = vmatpush3.msra.mxu0 %v46_v3  ;;  %846 = vmatpush3.msra.mxu1 %v46_v3 }
   0xa   :  { %785 = vmatprep.subr.mxu0 %v45_v4  ;;  %841 = vmatprep.subr.mxu1 %v45_v4 }
   0xb   :  { %786 = vmatpush3.msra.mxu0 %v45_v4  ;;  %847 = vmatpush3.msra.mxu1 %v45_v4 }
   0xc   :  { %787 = vmatprep.subr.mxu0 %v44_v5  ;;  %842 = vmatprep.subr.mxu1 %v44_v5 }
   0xd   :  { %788 = vmatpush3.msra.mxu0 %v44_v5  ;;  %848 = vmatpush3.msra.mxu1 %v44_v5 }
   0xe   :  { %7 = vsyncpa [#allocation3], 0  ;;  %789 = vmatprep.mubr.msk.f32.mxu0 %vm50_vm0, %v12_v6  ;;  %813 = vmatprep.mubr.msk.f32.mxu1 %vm50_vm0, %v28_v7  ;;  %v15_v12 = vld [vmem:[%s1041_s0 + $0x18] sm:$0xff]  ;;  %v16_v14 = vld [vmem:[%s1041_s0 + $0x20] sm:$0xff] }
   0xf   :  { %790 = vmatmul.mubr.msk.f32.vlgmr.msra.gmra.mxu0 %vm50_vm0, %v13_v8  ;;  %814 = vmatmul.mubr.msk.f32.vlgmr.msra.gmra.mxu1 %vm50_vm0, %v29_v9  ;;  %v31_v13 = vld [vmem:[%s1041_s0 + $0x98] sm:$0xff]  ;;  %v32_v15 = vld [vmem:[%s1041_s0 + $0xa0] sm:$0xff]  ;;  %v17_v16 = vld [vmem:[%s1041_s0 + $0x28] sm:$0xff] }
  0x10   :  { %792 = vmatprep.mubr.msk.f32.mxu0 %vm50_vm0, %v14_v10  ;;  %816 = vmatprep.mubr.msk.f32.mxu1 %vm50_vm0, %v30_v11  ;;  %v33_v17 = vld [vmem:[%s1041_s0 + $0xa8] sm:$0xff]  ;;  %v18_v18 = vld [vmem:[%s1041_s0 + $0x30] sm:$0xff]  ;;  %v19_v20 = vld [vmem:[%s1041_s0 + $0x38] sm:$0xff] }
  0x11   :  { %v34_v19 = vld [vmem:[%s1041_s0 + $0xb0] sm:$0xff]  ;;  %v35_v21 = vld [vmem:[%s1041_s0 + $0xb8] sm:$0xff]  ;;  %v20_v22 = vld [vmem:[%s1041_s0 + $0x40] sm:$0xff] }
  0x12   :  { %v36_v23 = vld [vmem:[%s1041_s0 + $0xc0] sm:$0xff]  ;;  %v21_v24 = vld [vmem:[%s1041_s0 + $0x48] sm:$0xff]  ;;  %v22_v26 = vld [vmem:[%s1041_s0 + $0x50] sm:$0xff] }
  0x13   :  { %793 = vmatmul.mubr.msk.f32.gmra.mxu0 %vm50_vm0, %v15_v12  ;;  %817 = vmatmul.mubr.msk.f32.gmra.mxu1 %vm50_vm0, %v31_v13  ;;  %v37_v25 = vld [vmem:[%s1041_s0 + $0xc8] sm:$0xff]  ;;  %v38_v27 = vld [vmem:[%s1041_s0 + $0xd0] sm:$0xff]  ;;  %v23_v28 = vld [vmem:[%s1041_s0 + $0x58] sm:$0xff] }
  0x14   :  { %795 = vmatprep.mubr.msk.f32.mxu0 %vm50_vm0, %v16_v14  ;;  %819 = vmatprep.mubr.msk.f32.mxu1 %vm50_vm0, %v32_v15  ;;  %v39_v29 = vld [vmem:[%s1041_s0 + $0xd8] sm:$0xff]  ;;  %v24_v30 = vld [vmem:[%s1041_s0 + $0x60] sm:$0xff]  ;;  %v25_v32 = vld [vmem:[%s1041_s0 + $0x68] sm:$0xff] }
  0x15   :  { %v40_v31 = vld [vmem:[%s1041_s0 + $0xe0] sm:$0xff]  ;;  %v41_v33 = vld [vmem:[%s1041_s0 + $0xe8] sm:$0xff]  ;;  %v26_v34 = vld [vmem:[%s1041_s0 + $0x70] sm:$0xff] }
  0x16   :  { %v42_v35 = vld [vmem:[%s1041_s0 + $0xf0] sm:$0xff]  ;;  %v27_v36 = vld [vmem:[%s1041_s0 + $0x78] sm:$0xff] }
  0x17   :  { %796 = vmatmul.mubr.msk.f32.gmra.mxu0 %vm50_vm0, %v17_v16  ;;  %820 = vmatmul.mubr.msk.f32.gmra.mxu1 %vm50_vm0, %v33_v17  ;;  %v43_v37 = vld [vmem:[%s1041_s0 + $0xf8] sm:$0xff]  ;;  %s874_s0 = smov [#allocation2]  }
  0x18   :  { %798 = vmatprep.mubr.msk.f32.mxu0 %vm50_vm0, %v18_v18  ;;  %822 = vmatprep.mubr.msk.f32.mxu1 %vm50_vm0, %v34_v19  ;;  %s537_s1 = sshll.u32 %s874_s0, 4  ;;  %s538_s1 = int_to_ptr.vmem [resolvable:$true] %s537_s1 }
  0x19   :  { %s852_s27 = scalar_lea.vmem %s538_s1, 2048  ;;  %p857_p1 = scmp.lt.s32.totalorder %s538_s1, %s538_s1 }
  0x1a   :  { %p853_p0 = scmp.ne.s32.totalorder %s538_s1, %s852_s27  ;;  %p858_p2 = scmp.lt.s32.totalorder %s852_s27, %s852_s27 }
  0x1b   :  { %799 = vmatmul.mubr.msk.f32.gmra.mxu0 %vm50_vm0, %v19_v20  ;;  %823 = vmatmul.mubr.msk.f32.gmra.mxu1 %vm50_vm0, %v35_v21 }
  0x1c   :  { %801 = vmatprep.mubr.msk.f32.mxu0 %vm50_vm0, %v20_v22  ;;  %825 = vmatprep.mubr.msk.f32.mxu1 %vm50_vm0, %v36_v23  ;;  %p859_p3 = por %p858_p2, %p857_p1 }
  0x1e   :  { %p860_p4 = pnand %p859_p3, %p853_p0 }
  0x1f   :  { %802 = vmatmul.mubr.msk.f32.gmra.mxu0 %vm50_vm0, %v21_v24  ;;  %826 = vmatmul.mubr.msk.f32.gmra.mxu1 %vm50_vm0, %v37_v25 }
  0x20   :  { %804 = vmatprep.mubr.msk.f32.mxu0 %vm50_vm0, %v22_v26  ;;  %828 = vmatprep.mubr.msk.f32.mxu1 %vm50_vm0, %v38_v27 }
  0x23   :  { %805 = vmatmul.mubr.msk.f32.gmra.mxu0 %vm50_vm0, %v23_v28  ;;  %829 = vmatmul.mubr.msk.f32.gmra.mxu1 %vm50_vm0, %v39_v29 }
  0x24   :  { %807 = vmatprep.mubr.msk.f32.mxu0 %vm50_vm0, %v24_v30  ;;  %831 = vmatprep.mubr.msk.f32.mxu1 %vm50_vm0, %v40_v31 }
  0x27   :  { %808 = vmatmul.mubr.msk.f32.gmra.mxu0 %vm50_vm0, %v25_v32  ;;  %832 = vmatmul.mubr.msk.f32.gmra.mxu1 %vm50_vm0, %v41_v33 }
  0x28   :  { %810 = vmatprep.mubr.msk.f32.mxu0 %vm50_vm0, %v26_v34  ;;  %834 = vmatprep.mubr.msk.f32.mxu1 %vm50_vm0, %v42_v35 }
  0x2b   :  { %811 = vmatmul.mubr.msk.f32.gmra.mxu0 %vm50_vm0, %v27_v36  ;;  %835 = vmatmul.mubr.msk.f32.gmra.mxu1 %vm50_vm0, %v43_v37 }
  0xcf   :  { %v791_v38 = vpop.f32.mrf.mxu0  ;;  %v815_v39 = vpop.f32.mrf.mxu1 }
  0xd1   :  { %v213_v40 = vpop.f32.mrf.mxu0  ;;  %v293_v41 = vpop.f32.mrf.mxu1 }
  0xd2   :  { %v647_v42 = vpack.c.bf16 %v791_v38, %v213_v40  ;;  %v687_v43 = vpack.c.bf16 %v815_v39, %v293_v41 }
  0xd3   :  { %v794_v44 = vpop.f32.mrf.mxu0  ;;  %v818_v45 = vpop.f32.mrf.mxu1 }
  0xd4   :  { %648 = vst [vmem:[#allocation2] sm:$0xff] %v647_v42   ;;  %731 = vst [vmem:[#allocation2 + $0x40] sm:$0xff] %v687_v43  }
  0xd5   :  { %v223_v46 = vpop.f32.mrf.mxu0  ;;  %v303_v47 = vpop.f32.mrf.mxu1 }
  0xd6   :  { %v652_v48 = vpack.c.bf16 %v794_v44, %v223_v46  ;;  %v692_v49 = vpack.c.bf16 %v818_v45, %v303_v47 }
  0xd7   :  { %v797_v50 = vpop.f32.mrf.mxu0  ;;  %v821_v51 = vpop.f32.mrf.mxu1 }
  0xd8   :  { %724 = vst [vmem:[#allocation2 + $0x8] sm:$0xff] %v652_v48   ;;  %732 = vst [vmem:[#allocation2 + $0x48] sm:$0xff] %v692_v49  }
  0xd9   :  { %v233_v52 = vpop.f32.mrf.mxu0  ;;  %v313_v53 = vpop.f32.mrf.mxu1 }
  0xda   :  { %v657_v54 = vpack.c.bf16 %v797_v50, %v233_v52  ;;  %v697_v55 = vpack.c.bf16 %v821_v51, %v313_v53 }
  0xdb   :  { %v800_v56 = vpop.f32.mrf.mxu0  ;;  %v824_v57 = vpop.f32.mrf.mxu1 }
  0xdc   :  { %725 = vst [vmem:[#allocation2 + $0x10] sm:$0xff] %v657_v54   ;;  %733 = vst [vmem:[#allocation2 + $0x50] sm:$0xff] %v697_v55  }
  0xdd   :  { %v243_v58 = vpop.f32.mrf.mxu0  ;;  %v323_v59 = vpop.f32.mrf.mxu1 }
  0xde   :  { %v662_v60 = vpack.c.bf16 %v800_v56, %v243_v58  ;;  %v702_v61 = vpack.c.bf16 %v824_v57, %v323_v59 }
  0xdf   :  { %v803_v62 = vpop.f32.mrf.mxu0  ;;  %v827_v63 = vpop.f32.mrf.mxu1 }
  0xe0   :  { %726 = vst [vmem:[#allocation2 + $0x18] sm:$0xff] %v662_v60   ;;  %734 = vst [vmem:[#allocation2 + $0x58] sm:$0xff] %v702_v61  }
  0xe1   :  { %v253_v0 = vpop.f32.mrf.mxu0  ;;  %v333_v1 = vpop.f32.mrf.mxu1 }
  0xe2   :  { %v667_v2 = vpack.c.bf16 %v803_v62, %v253_v0  ;;  %v707_v3 = vpack.c.bf16 %v827_v63, %v333_v1 }
  0xe3   :  { %v806_v4 = vpop.f32.mrf.mxu0  ;;  %v830_v5 = vpop.f32.mrf.mxu1 }
  0xe4   :  { %727 = vst [vmem:[#allocation2 + $0x20] sm:$0xff] %v667_v2   ;;  %735 = vst [vmem:[#allocation2 + $0x60] sm:$0xff] %v707_v3  }
  0xe5   :  { %v263_v6 = vpop.f32.mrf.mxu0  ;;  %v343_v7 = vpop.f32.mrf.mxu1 }
  0xe6   :  { %v672_v8 = vpack.c.bf16 %v806_v4, %v263_v6  ;;  %v712_v9 = vpack.c.bf16 %v830_v5, %v343_v7 }
  0xe7   :  { %v809_v10 = vpop.f32.mrf.mxu0  ;;  %v833_v11 = vpop.f32.mrf.mxu1 }
  0xe8   :  { %728 = vst [vmem:[#allocation2 + $0x28] sm:$0xff] %v672_v8   ;;  %736 = vst [vmem:[#allocation2 + $0x68] sm:$0xff] %v712_v9  }
  0xe9   :  { %v273_v12 = vpop.f32.mrf.mxu0  ;;  %v353_v13 = vpop.f32.mrf.mxu1 }
  0xea   :  { %v677_v14 = vpack.c.bf16 %v809_v10, %v273_v12  ;;  %v717_v15 = vpack.c.bf16 %v833_v11, %v353_v13 }
  0xeb   :  { %v812_v16 = vpop.f32.mrf.mxu0  ;;  %v836_v17 = vpop.f32.mrf.mxu1 }
  0xec   :  { %729 = vst [vmem:[#allocation2 + $0x30] sm:$0xff] %v677_v14   ;;  %737 = vst [vmem:[#allocation2 + $0x70] sm:$0xff] %v717_v15  }
  0xed   :  { %v283_v18 = vpop.f32.mrf.mxu0  ;;  %v363_v19 = vpop.f32.mrf.mxu1 }
  0xee   :  { %v682_v20 = vpack.c.bf16 %v812_v16, %v283_v18  ;;  %v722_v21 = vpack.c.bf16 %v836_v17, %v363_v19 }
  0xf0   :  { %730 = vst [vmem:[#allocation2 + $0x38] sm:$0xff] %v682_v20   ;;  %738 = vst [vmem:[#allocation2 + $0x78] sm:$0xff] %v722_v21  }
  0xf1   :  { %863 = shalt.err (!%p860_p4)
}
  0xf2   :  { %s875_s28 = smov 64   ;;  %s876_s29 = smov 4  }
  0xf3   :  { %543 = dma.vmem_to_hbm [thread:$0]  %s538_s1, 2048, %s1043_s2, [#allocation3], %s875_s28, %s875_s28, %s876_s29  }
  0xf4   :  { %872 = dma.done.wait [#allocation3], 2048  }
  0xf5   :  { %873 = vsyncadd [#allocation3], 4294965248 }
  0xf6   :  { %547 = vsyncpa [#allocation3], 1 }

</bundles_post_ra>
